<compile_context>
chip_gen: v6e
topology: v6e:2x2x1
jax: 0.10.0
libtpu: 0.0.40
codegen_flags: <defaults>
</compile_context>

<pallas_src>
import numpy as np
import jax
import jax.numpy as jnp
from jax.experimental import pallas as pl
from jax.experimental.pallas import tpu as pltpu

BN_EPS = 1e-5
ROW_TILE_MAX = 512      # point rows per MLP grid step (multiple of 64)
SEG_TILE = 32           # voxels pooled per segmax group
VMEM_LIMIT = 32 * 1024 * 1024

_MLP_PARAMS = pltpu.CompilerParams(
    dimension_semantics=("parallel",), vmem_limit_bytes=VMEM_LIMIT)
_SEG_PARAMS = pltpu.CompilerParams(
    dimension_semantics=("parallel", "arbitrary"), vmem_limit_bytes=VMEM_LIMIT)


# ----------------------------------------------------------------------------
# small host helpers
# ----------------------------------------------------------------------------
def _round_up(x, m):
    return ((x + m - 1) // m) * m


def _pick_row_tile(n):
    """Big tiles amortize the ~0.35us/step overhead; keep >= 2 grid steps once
    the cloud is large enough (v7x megacore) and a multiple of 64 rows."""
    if n >= 1024:
        return ROW_TILE_MAX
    return max(64, _round_up(pl.cdiv(max(n, 1), 2), 64))


def _bucket_tiles(t):
    """Geometric-ish bucketing of the tile count (waste <= ~12.5%)."""
    if t <= 8:
        return t
    p = 1
    while p * 8 < t:
        p *= 2
    return _round_up(t, p)


# ----------------------------------------------------------------------------
# in-kernel helpers
# ----------------------------------------------------------------------------
def _row_mask(tile_rows, tile_idx, n_valid):
    """(tile_rows, 1) f32 mask of rows whose global index < n_valid."""
    row = jax.lax.broadcasted_iota(jnp.int32, (tile_rows, 1), 0) + tile_idx * tile_rows
    return (row < n_valid).astype(jnp.float32)


def _partial_moments(y, mask):
    """Masked partial moments (sum, sum_sq) over valid rows of this tile."""
    ym = y * mask
    return (jnp.sum(ym, axis=0, keepdims=True),
            jnp.sum(ym * y, axis=0, keepdims=True))


def _spread8(v):
    """(1, C) -> (8, C): row 0 = v, rows 1..7 = 0 (sublane-aligned stat tile)."""
    r = jax.lax.broadcasted_iota(jnp.int32, (8, 1), 0)
    return jnp.where(r == 0, v, 0.0)


# ----------------------------------------------------------------------------
# MLP kernels (row-tiled; BN affine is a precomputed (1, C) scale/shift)
# ----------------------------------------------------------------------------
def linear_stats_kernel(n_ref, x_ref, w_ref, c_ref, y_ref, ps_ref, pq_ref):
    """y = x @ W + c  (BN0 already folded into W/c on the host) + y moments."""
    i = pl.program_id(0)
    y = jnp.dot(x_ref[...].astype(jnp.bfloat16), w_ref[...],
                preferred_element_type=jnp.float32) + c_ref[...]
    y_ref[...] = y.astype(y_ref.dtype)                      # bf16 inter-pass store
    s, s2 = _partial_moments(y, _row_mask(y.shape[0], i, n_ref[0]))
    ps_ref[...] = _spread8(s)
    pq_ref[...] = _spread8(s2)


def bn_relu_linear_stats_kernel(n_ref, h_ref, sc_ref, sh_ref, w_ref, c_ref,
                                y_ref, ps_ref, pq_ref):
    """y = relu(h*scale + shift) @ W + c, plus partial moments of y."""
    i = pl.program_id(0)
    a = jnp.maximum(h_ref[...].astype(jnp.float32) * sc_ref[...] + sh_ref[...], 0.0)
    y = jnp.dot(a.astype(jnp.bfloat16), w_ref[...],
                preferred_element_type=jnp.float32) + c_ref[...]
    y_ref[...] = y.astype(y_ref.dtype)
    s, s2 = _partial_moments(y, _row_mask(y.shape[0], i, n_ref[0]))
    ps_ref[...] = _spread8(s)
    pq_ref[...] = _spread8(s2)


def bn_relu_linear_kernel(n_ref, h_ref, sc_ref, sh_ref, w_ref, c_ref, y_ref):
    """Final layer: relu(h*scale + shift) @ W4 + c4 (f32 output, no stats)."""
    a = jnp.maximum(h_ref[...].astype(jnp.float32) * sc_ref[...] + sh_ref[...], 0.0)
    y_ref[...] = jnp.dot(a.astype(jnp.bfloat16), w_ref[...],
                         preferred_element_type=jnp.float32) + c_ref[...]


# ----------------------------------------------------------------------------
# segmented-max kernel (rows sorted by voxel id -> contiguous segments)
# ----------------------------------------------------------------------------
def segmax_kernel(first_ref, last_ref, gblk0_ref, gnblk_ref,
                  feat_ref, out_ref, acc_ref):
    """Grid = (voxel groups, row windows).  Each inner step sees one
    (seg_blk, C) window of the sorted features; every voxel of the group
    elementwise-maxes its own 8-row-aligned chunks into acc_ref[j] and a single
    cross-sublane reduce per group produces the dense (SEG_TILE, C) output."""
    g = pl.program_id(0)
    b = pl.program_id(1)
    seg_blk = feat_ref.shape[0]

    @pl.when(b == 0)
    def _():
        acc_ref[...] = jnp.full(acc_ref.shape, -jnp.inf, acc_ref.dtype)

    @pl.when(b < gnblk_ref[g])
    def _():
        w0 = (gblk0_ref[g] + b) * seg_blk                   # global row of window start

        @pl.loop(0, SEG_TILE)
        def _(j):
            f = first_ref[g * SEG_TILE + j]
            l = last_ref[g * SEG_TILE + j]
            lo = jnp.maximum(f, w0)
            hi = jnp.minimum(l, w0 + seg_blk - 1)
            c_lo = (lo - w0) // 8
            n_chunks = jnp.maximum((hi - w0) // 8 + 1 - c_lo, 0)

            def chunk_body(ci, acc):
                r0 = pl.multiple_of((c_lo + ci) * 8, 8)
                rows = feat_ref[pl.ds(r0, 8), :]
                rid = jax.lax.broadcasted_iota(jnp.int32, (8, 1), 0) + (w0 + r0)
                valid = (rid >= f) & (rid <= l)
                return jnp.maximum(acc, jnp.where(valid, rows, -jnp.inf))

            acc_ref[j] = jax.lax.fori_loop(0, n_chunks, chunk_body, acc_ref[j])

    @pl.when(b == pl.num_programs(1) - 1)
    def _():
        out_ref[...] = jnp.max(acc_ref[...], axis=1)


# ----------------------------------------------------------------------------
# pallas_call wrappers
# ----------------------------------------------------------------------------
def run_mlp(x_pad, n_valid, kp, row_tile):
    """stats0(jnp) -> Linear1(+BN0 fold) -> BN1+ReLU+L2 -> BN2+ReLU+L3 -> BN3+ReLU+L4."""
    n_rows, feat_dim = x_pad.shape
    n_tiles = n_rows // row_tile
    t8 = n_tiles * 8
    nv = jnp.asarray([n_valid], jnp.int32)          # SMEM scalar (no recompile per n)
    cnt = jnp.float32(max(n_valid, 1))              # guard n == 0

    def tile(c):
        return pl.BlockSpec((row_tile, c), lambda i, n: (i, 0))

    def full(r, c):
        return pl.BlockSpec((r, c), lambda i, n: (0, 0))

    def stat(c):
        return pl.BlockSpec((8, c), lambda i, n: (i, 0))

    # ---- BN0 with plain jnp (x is N x 9; two-pass variance) folded into W1/c1.
    mask = (jnp.arange(n_rows) < n_valid)[:, None].astype(jnp.float32)
    mean0 = jnp.sum(x_pad * mask, axis=0, keepdims=True) / cnt
    var0 = jnp.sum(((x_pad - mean0) ** 2) * mask, axis=0, keepdims=True) / cnt
    scale0 = kp["g0"] * jax.lax.rsqrt(var0 + BN_EPS)
    shift0 = kp["b0"] - mean0 * scale0
    w1f = (scale0.reshape(-1, 1) * kp["w1"]).astype(jnp.bfloat16)
    c1f = shift0 @ kp["w1"] + kp["c1"]

    def affine_from_moments(ps, pq, gamma, beta):
        mean = jnp.sum(ps, axis=0, keepdims=True) / cnt
        var = jnp.maximum(jnp.sum(pq, axis=0, keepdims=True) / cnt - mean * mean, 0.0)
        scale = gamma * jax.lax.rsqrt(var + BN_EPS)
        return scale, beta - mean * scale

    d1 = kp["w1"].shape[1]

    # ---- pass 1: (BN0-folded) Linear1 + partial moments of h1 --------------
    h, ps, pq = pl.pallas_call(
        linear_stats_kernel,
        grid_spec=pltpu.PrefetchScalarGridSpec(
            num_scalar_prefetch=1, grid=(n_tiles,),
            in_specs=[tile(feat_dim), full(feat_dim, d1), full(1, d1)],
            out_specs=[tile(d1), stat(d1), stat(d1)]),
        out_shape=(jax.ShapeDtypeStruct((n_rows, d1), jnp.bfloat16),
                   jax.ShapeDtypeStruct((t8, d1), jnp.float32),
                   jax.ShapeDtypeStruct((t8, d1), jnp.float32)),
        compiler_params=_MLP_PARAMS,
    )(nv, x_pad, w1f, c1f)

    def bn_relu_linear_pass(h, sc, sh, w, c, out_dtype, with_stats):
        din, dout = h.shape[1], w.shape[1]
        in_specs = [tile(din), full(1, din), full(1, din), full(din, dout), full(1, dout)]
        if with_stats:
            return pl.pallas_call(
                bn_relu_linear_stats_kernel,
                grid_spec=pltpu.PrefetchScalarGridSpec(
                    num_scalar_prefetch=1, grid=(n_tiles,),
                    in_specs=in_specs,
                    out_specs=[tile(dout), stat(dout), stat(dout)]),
                out_shape=(jax.ShapeDtypeStruct((n_rows, dout), out_dtype),
                           jax.ShapeDtypeStruct((t8, dout), jnp.float32),
                           jax.ShapeDtypeStruct((t8, dout), jnp.float32)),
                compiler_params=_MLP_PARAMS,
            )(nv, h, sc, sh, w, c)
        return pl.pallas_call(
            bn_relu_linear_kernel,
            grid_spec=pltpu.PrefetchScalarGridSpec(
                num_scalar_prefetch=1, grid=(n_tiles,),
                in_specs=in_specs, out_specs=tile(dout)),
            out_shape=jax.ShapeDtypeStruct((n_rows, dout), out_dtype),
            compiler_params=_MLP_PARAMS,
        )(nv, h, sc, sh, w, c)

    # ---- passes 2, 3: BN + ReLU + Linear (+ moments of the new activation) --
    sc, sh = affine_from_moments(ps, pq, kp["g1"], kp["b1"])
    h, ps, pq = bn_relu_linear_pass(h, sc, sh, kp["w2"], kp["c2"], jnp.bfloat16, True)
    sc, sh = affine_from_moments(ps, pq, kp["g2"], kp["b2"])
    h, ps, pq = bn_relu_linear_pass(h, sc, sh, kp["w3"], kp["c3"], jnp.bfloat16, True)

    # ---- pass 4: BN3 + ReLU + Linear4 (f32 output) ---------------------------
    sc, sh = affine_from_moments(ps, pq, kp["g3"], kp["b3"])
    return bn_relu_linear_pass(h, sc, sh, kp["w4"], kp["c4"], jnp.float32, False)


def run_segmax(feats, first_idx, last_idx, gblk0, gnblk, max_blocks, seg_blk):
    """Segmented max over rows sorted by voxel id; feats streamed per window."""
    n_rows, c = feats.shape
    s_pad = first_idx.shape[0]
    n_groups = s_pad // SEG_TILE
    n_row_blocks = n_rows // seg_blk

    def feats_map(g, b, first, last, g0, gn):
        blk = g0[g] + jnp.minimum(b, gn[g] - 1)        # clamp: skipped steps reuse block
        return (jnp.minimum(blk, n_row_blocks - 1), 0)

    return pl.pallas_call(
        segmax_kernel,
        grid_spec=pltpu.PrefetchScalarGridSpec(
            num_scalar_prefetch=4, grid=(n_groups, max_blocks),
            in_specs=[pl.BlockSpec((seg_blk, c), feats_map)],
            out_specs=pl.BlockSpec((SEG_TILE, c), lambda g, b, *_: (g, 0)),
            scratch_shapes=[pltpu.VMEM((SEG_TILE, 8, c), jnp.float32)]),
        out_shape=jax.ShapeDtypeStruct((s_pad, c), jnp.float32),
        compiler_params=_SEG_PARAMS,
    )(first_idx, last_idx, gblk0, gnblk, feats)


# ----------------------------------------------------------------------------
# parameters
# ----------------------------------------------------------------------------
def init_params(key, feat_dim=9, output_feat_dim=256):
    dims = [feat_dim, 64, 128, 256, output_feat_dim]
    params = {"g0": jnp.ones((1, feat_dim), jnp.float32),
              "b0": jnp.zeros((1, feat_dim), jnp.float32)}
    for i, (din, dout) in enumerate(zip(dims[:-1], dims[1:]), start=1):
        key, kw, kb = jax.random.split(key, 3)
        bound = 1.0 / np.sqrt(din)                       # PyTorch Linear init
        params[f"w{i}"] = jax.random.uniform(kw, (din, dout), jnp.float32, -bound, bound)
        params[f"c{i}"] = jax.random.uniform(kb, (1, dout), jnp.float32, -bound, bound)
        if i < 4:
            params[f"g{i}"] = jnp.ones((1, dout), jnp.float32)
            params[f"b{i}"] = jnp.zeros((1, dout), jnp.float32)
    return params


def prepare_params(raw):
    """Kernel-side params: layer-1 width padded 64 -> 128 lanes (zero columns of
    W1 / rows of W2, exact), matmul weights pre-cast to bf16 once."""
    d1p = 128
    kp = {"g0": raw["g0"], "b0": raw["b0"]}
    kp["w1"] = jnp.zeros((raw["w1"].shape[0], d1p), jnp.float32).at[:, :64].set(raw["w1"])
    kp["c1"] = jnp.zeros((1, d1p), jnp.float32).at[:, :64].set(raw["c1"])
    kp["g1"] = jnp.ones((1, d1p), jnp.float32).at[:, :64].set(raw["g1"])
    kp["b1"] = jnp.zeros((1, d1p), jnp.float32).at[:, :64].set(raw["b1"])
    w2 = jnp.zeros((d1p, raw["w2"].shape[1]), jnp.float32).at[:64, :].set(raw["w2"])
    kp["w2"] = w2.astype(jnp.bfloat16)
    kp["c2"], kp["g2"], kp["b2"] = raw["c2"], raw["g2"], raw["b2"]
    kp["w3"] = raw["w3"].astype(jnp.bfloat16)
    kp["c3"], kp["g3"], kp["b3"] = raw["c3"], raw["g3"], raw["b3"]
    kp["w4"] = raw["w4"].astype(jnp.bfloat16)
    kp["c4"] = raw["c4"]
    return kp


# ----------------------------------------------------------------------------
# forward (host glue + kernels)
# ----------------------------------------------------------------------------
def feature_encoder_forward(point_feat, point_index, raw_params, shuffle_key):
    kp = prepare_params(raw_params)

    # F.pad(point_index[b], (1, 0), value=b) + concat over the batch.
    cat_idx = []
    for bi, idx in enumerate(point_index):
        pad = jnp.full((idx.shape[0], 1), bi, idx.dtype)
        cat_idx.append(jnp.concatenate([pad, idx], axis=1))
    feats = jnp.concatenate(point_feat, axis=0)
    cat_idx = jnp.concatenate(cat_idx, axis=0)
    n = int(feats.shape[0])

    # torch.randperm shuffle (result is permutation-invariant).
    perm = jax.random.permutation(shuffle_key, n)
    feats = feats[perm]
    cat_idx = cat_idx[perm]

    # torch.unique(dim=0): data-dependent sizes -> host-side numpy glue.
    unq_index, unq_inv, unq_cnt = np.unique(
        np.asarray(cat_idx), axis=0, return_inverse=True, return_counts=True)
    unq_inv = unq_inv.reshape(-1).astype(np.int32)
    n_unique = int(unq_index.shape[0])

    # Sort points by voxel id -> contiguous segments for the O(N*C) segmax.
    order = np.argsort(unq_inv, kind="stable")
    feats = feats[jnp.asarray(order)]
    ends = np.cumsum(unq_cnt).astype(np.int32)
    first = ends - unq_cnt.astype(np.int32)
    last = ends - 1

    # Static row padding (bucketed) for the MLP grid.
    row_tile = _pick_row_tile(n)
    n_tiles = _bucket_tiles(pl.cdiv(n, row_tile))
    n_pad = row_tile * n_tiles
    feats_pad = jnp.zeros((n_pad, feats.shape[1]), jnp.float32).at[:n].set(feats)

    # Per-voxel ranges + per-group row-window table for segmax.  Padded voxel
    # slots point at the last real row (keeps group spans tight; output discarded).
    s_pad = SEG_TILE * max(1, pl.cdiv(n_unique, SEG_TILE))
    first_pad = np.full((s_pad,), max(n - 1, 0), np.int32)
    last_pad = np.full((s_pad,), max(n - 1, 0), np.int32)
    first_pad[:n_unique] = first
    last_pad[:n_unique] = last
    n_groups = s_pad // SEG_TILE
    seg_blk = row_tile                                   # window rows divide n_pad
    gfirst = first_pad.reshape(n_groups, SEG_TILE).min(axis=1)
    glast = last_pad.reshape(n_groups, SEG_TILE).max(axis=1)
    gblk0 = (gfirst // seg_blk).astype(np.int32)
    gnblk = (glast // seg_blk - gblk0 + 1).astype(np.int32)
    max_blocks = int(gnblk.max())
    # TODO(synk): pathologically skewed voxel sizes inflate max_blocks; skipped
    # inner steps only pay the ~0.35us step overhead (block index is clamped).

    processed = run_mlp(feats_pad, n, kp, row_tile)                  # (n_pad, 256) f32
    pooled = run_segmax(processed, jnp.asarray(first_pad), jnp.asarray(last_pad),
                        jnp.asarray(gblk0), jnp.asarray(gnblk),
                        max_blocks, seg_blk)[:n_unique]              # (n_unique, 256)

    # TODO(synk): torch returns int64 unq_index; JAX default x64 is off -> int32.
    # Extra returns (processed rows, sort order, inverse map) are only for the
    # correctness check; the module returns (unq_index, pooled).
    return (jnp.asarray(unq_index.astype(np.int32)), pooled,
            processed[:n], order, unq_inv)


# ----------------------------------------------------------------------------
# Pure-JAX reference: module-faithful BN -> Linear -> ReLU chain, mirroring the
# kernel's precision choices (bf16 MXU operands, bf16 inter-layer activation
# storage, f32 accumulation) so the tolerance checks the BN / fold / pooling
# logic rather than bf16 rounding.
# ----------------------------------------------------------------------------
def mlp_ref(x, p):
    def bn(v, g, b):
        mean = v.mean(0, keepdims=True)
        var = ((v - mean) ** 2).mean(0, keepdims=True)
        return (v - mean) / jnp.sqrt(var + BN_EPS) * g + b

    def dot(a, w):
        return jnp.dot(a.astype(jnp.bfloat16), w.astype(jnp.bfloat16),
                       preferred_element_type=jnp.float32)

    def trunc(v):                                        # bf16 inter-layer storage
        return v.astype(jnp.bfloat16).astype(jnp.float32)

    h = trunc(dot(bn(x, p["g0"], p["b0"]), p["w1"]) + p["c1"])
    h = trunc(dot(jax.nn.relu(bn(h, p["g1"], p["b1"])), p["w2"]) + p["c2"])
    h = trunc(dot(jax.nn.relu(bn(h, p["g2"], p["b2"])), p["w3"]) + p["c3"])
    return dot(jax.nn.relu(bn(h, p["g3"], p["b3"])), p["w4"]) + p["c4"]


if __name__ == "__main__":
    key = jax.random.PRNGKey(0)
    feat_dim, output_feat_dim = 9, 256
    counts = [37, 27]                        # 2 batches of points

    point_feat, point_index = [], []
    for cnt in counts:
        key, kf, ki = jax.random.split(key, 3)
        point_feat.append(jax.random.normal(kf, (cnt, feat_dim), jnp.float32))
        point_index.append(jax.random.randint(ki, (cnt, 3), 0, 4, jnp.int32))

    key, kp_shuffle, kparam = jax.random.split(key, 3)
    params = init_params(kparam, feat_dim, output_feat_dim)

    unq_index, pooled, processed_valid, order, unq_inv = feature_encoder_forward(
        point_feat, point_index, params, kp_shuffle)
    jax.block_until_ready(pooled)

    # --- correctness check against the pure-JAX reference --------------------
    cat_idx = []
    for bi, idx in enumerate(point_index):
        pad = jnp.full((idx.shape[0], 1), bi, idx.dtype)
        cat_idx.append(jnp.concatenate([pad, idx], axis=1))
    feats_all = jnp.concatenate(point_feat, axis=0)
    perm = jax.random.permutation(kp_shuffle, feats_all.shape[0])
    feats_all = feats_all[perm]
    feats_sorted = feats_all[jnp.asarray(order)]
    inv_sorted = jnp.asarray(unq_inv[order].astype(np.int32))

    ref_proc = mlp_ref(feats_sorted, params)
    ref_pooled = jax.ops.segment_max(ref_proc, inv_sorted,
                                     num_segments=int(unq_index.shape[0]))

    np.testing.assert_allclose(np.asarray(processed_valid), np.asarray(ref_proc),
                               rtol=2e-2, atol=2e-2)
    np.testing.assert_allclose(np.asarray(pooled), np.asarray(ref_pooled),
                               rtol=2e-2, atol=2e-2)

    print("KERNEL_OK")
</pallas_src>

<mosaic_0001>
module attributes {stable_mosaic.version = 11 : i64} {
  func.func @linear_stats_kernel(%arg0: i32, %arg1: memref<1xi32, #tpu.memory_space<smem>>, %arg2: memref<64x9xf32, #tpu.memory_space<vmem>>, %arg3: memref<9x128xbf16, #tpu.memory_space<vmem>>, %arg4: memref<1x128xf32, #tpu.memory_space<vmem>>, %arg5: memref<64x128xbf16, #tpu.memory_space<vmem>>, %arg6: memref<8x128xf32, #tpu.memory_space<vmem>>, %arg7: memref<8x128xf32, #tpu.memory_space<vmem>>) attributes {dimension_semantics = [#tpu.dimension_semantics<parallel>], iteration_bounds = array<i64: 1>, scalar_prefetch = 1 : i64, scratch_operands = 0 : i64, tpu.core_type = #tpu.core_type<tc>, window_params = [{transform_indices = @transform_0, window_bounds = array<i64: 64, 9>}, {pipeline_mode = #tpu.pipeline_mode<synchronous>, transform_indices = @transform_1, window_bounds = array<i64: 9, 128>}, {pipeline_mode = #tpu.pipeline_mode<synchronous>, transform_indices = @transform_2, window_bounds = array<i64: 1, 128>}, {transform_indices = @transform_3, window_bounds = array<i64: 64, 128>}, {transform_indices = @transform_4, window_bounds = array<i64: 8, 128>}, {transform_indices = @transform_5, window_bounds = array<i64: 8, 128>}]} {
    %c0 = arith.constant 0 : index
    %c0_0 = arith.constant 0 : index
    %0 = vector.load %arg2[%c0, %c0_0] : memref<64x9xf32, #tpu.memory_space<vmem>>, vector<64x9xf32>
    %1 = arith.truncf %0 : vector<64x9xf32> to vector<64x9xbf16>
    %c0_1 = arith.constant 0 : index
    %c0_2 = arith.constant 0 : index
    %2 = vector.load %arg3[%c0_1, %c0_2] : memref<9x128xbf16, #tpu.memory_space<vmem>>, vector<9x128xbf16>
    %cst = arith.constant dense<0.000000e+00> : vector<64x128xf32>
    %3 = tpu.matmul %1, %2, %cst {dimension_numbers = #tpu.dot_dimension_numbers<[1], [0], [0], [1], [0, 0, 1, 1], [], []>} : vector<64x9xbf16>, vector<9x128xbf16>, vector<64x128xf32> -> vector<64x128xf32>
    %c0_3 = arith.constant 0 : index
    %c0_4 = arith.constant 0 : index
    %4 = vector.load %arg4[%c0_3, %c0_4] : memref<1x128xf32, #tpu.memory_space<vmem>>, vector<1x128xf32>
    %5 = vector.broadcast %4 : vector<1x128xf32> to vector<64x128xf32>
    %6 = arith.addf %3, %5 : vector<64x128xf32>
    %7 = arith.truncf %6 : vector<64x128xf32> to vector<64x128xbf16>
    %c0_5 = arith.constant 0 : index
    %c0_6 = arith.constant 0 : index
    %8 = vector.load %arg5[%c0_5, %c0_6] : memref<64x128xbf16, #tpu.memory_space<vmem>>, vector<64x128xbf16>
    tpu.vector_store %arg5[%c0_5, %c0_6], %7 {strides = array<i32>} : memref<64x128xbf16, #tpu.memory_space<vmem>>, vector<64x128xbf16>,
    %c0_7 = arith.constant 0 : index
    %9 = memref.load %arg1[%c0_7] : memref<1xi32, #tpu.memory_space<smem>>
    %10 = tpu.iota {dimensions = array<i32: 0>} : vector<64x1xi32>
    %c64_i32 = arith.constant 64 : i32
    %11 = arith.muli %arg0, %c64_i32 : i32
    %12 = vector.broadcast %11 : i32 to vector<64x1xi32>
    %13 = arith.addi %10, %12 : vector<64x1xi32>
    %14 = vector.broadcast %9 : i32 to vector<64x1xi32>
    %15 = arith.cmpi slt, %13, %14 : vector<64x1xi32>
    %16 = arith.extui %15 : vector<64x1xi1> to vector<64x1xi32>
    %17 = arith.sitofp %16 : vector<64x1xi32> to vector<64x1xf32>
    %18 = vector.broadcast %17 : vector<64x1xf32> to vector<64x128xf32>
    %19 = arith.mulf %6, %18 : vector<64x128xf32>
    %cst_8 = arith.constant dense<0.000000e+00> : vector<128xf32>
    %20 = vector.multi_reduction <add>, %19, %cst_8 [0] : vector<64x128xf32> to vector<128xf32>
    %21 = vector.shape_cast %20 : vector<128xf32> to vector<1x128xf32>
    %22 = arith.mulf %19, %6 : vector<64x128xf32>
    %cst_9 = arith.constant dense<0.000000e+00> : vector<128xf32>
    %23 = vector.multi_reduction <add>, %22, %cst_9 [0] : vector<64x128xf32> to vector<128xf32>
    %24 = vector.shape_cast %23 : vector<128xf32> to vector<1x128xf32>
    %25 = tpu.iota {dimensions = array<i32: 0>} : vector<8x1xi32>
    %c0_i32 = arith.constant 0 : i32
    %26 = vector.broadcast %c0_i32 : i32 to vector<8x1xi32>
    %27 = arith.cmpi eq, %25, %26 : vector<8x1xi32>
    %cst_10 = arith.constant 0.000000e+00 : f32
    %28 = vector.shape_cast %27 : vector<8x1xi1> to vector<8x1xi1>
    %29 = vector.broadcast %28 : vector<8x1xi1> to vector<8x128xi1>
    %30 = vector.shape_cast %21 : vector<1x128xf32> to vector<1x128xf32>
    %31 = vector.broadcast %30 : vector<1x128xf32> to vector<8x128xf32>
    %32 = vector.broadcast %cst_10 : f32 to vector<8x128xf32>
    %33 = arith.select %29, %31, %32 : vector<8x128xi1>, vector<8x128xf32>
    %c0_11 = arith.constant 0 : index
    %c0_12 = arith.constant 0 : index
    %34 = vector.load %arg6[%c0_11, %c0_12] : memref<8x128xf32, #tpu.memory_space<vmem>>, vector<8x128xf32>
    tpu.vector_store %arg6[%c0_11, %c0_12], %33 {strides = array<i32>} : memref<8x128xf32, #tpu.memory_space<vmem>>, vector<8x128xf32>,
    %35 = tpu.iota {dimensions = array<i32: 0>} : vector<8x1xi32>
    %c0_i32_13 = arith.constant 0 : i32
    %36 = vector.broadcast %c0_i32_13 : i32 to vector<8x1xi32>
    %37 = arith.cmpi eq, %35, %36 : vector<8x1xi32>
    %cst_14 = arith.constant 0.000000e+00 : f32
    %38 = vector.shape_cast %37 : vector<8x1xi1> to vector<8x1xi1>
    %39 = vector.broadcast %38 : vector<8x1xi1> to vector<8x128xi1>
    %40 = vector.shape_cast %24 : vector<1x128xf32> to vector<1x128xf32>
    %41 = vector.broadcast %40 : vector<1x128xf32> to vector<8x128xf32>
    %42 = vector.broadcast %cst_14 : f32 to vector<8x128xf32>
    %43 = arith.select %39, %41, %42 : vector<8x128xi1>, vector<8x128xf32>
    %c0_15 = arith.constant 0 : index
    %c0_16 = arith.constant 0 : index
    %44 = vector.load %arg7[%c0_15, %c0_16] : memref<8x128xf32, #tpu.memory_space<vmem>>, vector<8x128xf32>
    tpu.vector_store %arg7[%c0_15, %c0_16], %43 {strides = array<i32>} : memref<8x128xf32, #tpu.memory_space<vmem>>, vector<8x128xf32>,
    return
  }
  func.func @transform_0(%arg0: i32, %arg1: memref<1xi32, #tpu.memory_space<smem>>) -> (i32, i32) {
    %c0_i32 = arith.constant 0 : i32
    %c0_i32_0 = arith.constant 0 : i32
    return %arg0, %c0_i32 : i32, i32
  }
  func.func @transform_1(%arg0: i32, %arg1: memref<1xi32, #tpu.memory_space<smem>>) -> (i32, i32) {
    %c0_i32 = arith.constant 0 : i32
    %c0_i32_0 = arith.constant 0 : i32
    %c0_i32_1 = arith.constant 0 : i32
    return %c0_i32, %c0_i32_0 : i32, i32
  }
  func.func @transform_2(%arg0: i32, %arg1: memref<1xi32, #tpu.memory_space<smem>>) -> (i32, i32) {
    %c0_i32 = arith.constant 0 : i32
    %c0_i32_0 = arith.constant 0 : i32
    %c0_i32_1 = arith.constant 0 : i32
    return %c0_i32, %c0_i32_0 : i32, i32
  }
  func.func @transform_3(%arg0: i32, %arg1: memref<1xi32, #tpu.memory_space<smem>>) -> (i32, i32) {
    %c0_i32 = arith.constant 0 : i32
    %c0_i32_0 = arith.constant 0 : i32
    return %arg0, %c0_i32 : i32, i32
  }
  func.func @transform_4(%arg0: i32, %arg1: memref<1xi32, #tpu.memory_space<smem>>) -> (i32, i32) {
    %c0_i32 = arith.constant 0 : i32
    %c0_i32_0 = arith.constant 0 : i32
    return %arg0, %c0_i32 : i32, i32
  }
  func.func @transform_5(%arg0: i32, %arg1: memref<1xi32, #tpu.memory_space<smem>>) -> (i32, i32) {
    %c0_i32 = arith.constant 0 : i32
    %c0_i32_0 = arith.constant 0 : i32
    return %arg0, %c0_i32 : i32, i32
  }
}

</mosaic_0001>

<bundles_post_ra>
// kernel: tpu_custom_call.1
= control target key start
LH: loop header
LB: loop body
LE: loop exit
PB: predicated region body
PF: predicated region fallthrough
CT: control target
= control target key end

     0   :  { %13 = vsyncpa [#allocation5], 0  ;;  %vm61_vm0 = vcmask 1043456   ;;  %vm62_vm1 = vcmask 1044480   ;;  %vm48_vm2 = vcmask 72704   ;;  %v452_v3 = vmov 65535   ;;  %s590_s0 = inlined_call_operand.<no memory space> [shape: s32[1], index: 0, kind: input, shape index: {}]   ;;  %s591_s1 = inlined_call_operand.vmem [shape: f32[64,9], index: 1, kind: input, shape index: {}]   ;;  %s592_s2 = inlined_call_operand.vmem [shape: bf16[9,128], index: 2, kind: input, shape index: {}]   ;;  %s593_s3 = inlined_call_operand.vmem [shape: f32[1,128], index: 3, kind: input, shape index: {}]   ;;  %s594_s4 = inlined_call_operand.hbm [shape: bf16[64,128], index: 4, kind: output, shape index: {0}]   ;;  %s595_s5 = inlined_call_operand.hbm [shape: f32[8,128], index: 5, kind: output, shape index: {1}]   ;;  %s596_s6 = inlined_call_operand.hbm [shape: f32[8,128], index: 6, kind: output, shape index: {2}]  }
   0x1   :  { %v387_v0 = vld [vmem:[%s592_s2] sm:$0x1f]   ;;  %v23_v2 = vld [vmem:[%s591_s1 + $0x8] sm:$0xff]  ;;  %v63_v4 = vsel %vm61_vm0, 4294967295, %v452_v3  ;;  %v24_v8 = vld [vmem:[%s591_s1 + $0x10] sm:$0xff] }
   0x2   :  { %v22_v1 = vld [vmem:[%s591_s1] sm:$0xff]  ;;  %v27_v7 = vld [vmem:[%s591_s1 + $0x28] sm:$0xff]  ;;  %v64_v9 = vsel %vm62_vm1, %v63_v4, 0  ;;  %v25_v11 = vld [vmem:[%s591_s1 + $0x18] sm:$0xff] }
   0x3   :  { %v30_v5 = vpack.c.bf16 %v23_v2, %v22_v1  ;;  %v26_v6 = vld [vmem:[%s591_s1 + $0x20] sm:$0xff]  ;;  %v28_v12 = vld [vmem:[%s591_s1 + $0x30] sm:$0xff]  ;;  %v29_v13 = vld [vmem:[%s591_s1 + $0x38] sm:$0xff]  ;;  %v66_v14 = vand.u32 %v387_v0, %v64_v9 }
   0x4   :  { %v32_v10 = vpack.c.bf16 %v27_v7, %v26_v6 }
   0x5   :  { %370 = vmatprep.mubr.msk.bf16.mxu0 %vm48_vm2, %v30_v5 }
   0x6   :  { %14 = vsyncpa [#allocation7], 0  ;;  %374 = vmatprep.mubr.msk.bf16.mxu1 %vm48_vm2, %v32_v10  ;;  %368 = vmatprep.subr.bf16.mxu0 %v66_v14  ;;  %v31_v15 = vpack.c.bf16 %v25_v11, %v24_v8  ;;  %v33_v16 = vpack.c.bf16 %v29_v13, %v28_v12  ;;  %v174_v17 = vlaneseq  ;;  %v531_v20 = vstv %s590_s0  ;;  %v310_v26 = vld [vmem:[%s593_s3] ss:$0 sm:$0xff]  ;;  %s454_s0 = smov [#allocation4]  }
   0x7   :  { %378 = vmatprep.subr.bf16.mxu1 %v66_v14  ;;  %369 = vmatpush3.bf16.msra.mxu0 %v66_v14  ;;  %v453_v30 = vmov 0.0   ;;  %s272_s3 = sshll.u32 %s454_s0, 4  ;;  %s555_s3 = int_to_ptr.vmem [resolvable:$true] %s272_s3 }
   0x8   :  { %379 = vmatpush3.bf16.msra.mxu1 %v66_v14  ;;  %v525_v18 = vshrl.u32 %v174_v17, 7  ;;  %s388_s17 = scalar_lea.vmem %s555_s3, 512  ;;  %p393_p1 = scmp.lt.s32.totalorder %s555_s3, %s555_s3 }
   0x9   :  { %p389_p0 = scmp.ne.s32.totalorder %s555_s3, %s388_s17  ;;  %p394_p2 = scmp.lt.s32.totalorder %s388_s17, %s388_s17 }
   0xa   :  { %371 = vmatmul.mubr.msk.bf16.vlgmr.msra.gmra.mxu0 %vm48_vm2, %v31_v15  ;;  %v177_v19 = vadd.s32 16, %v525_v18  ;;  %v176_v21 = vadd.s32 8, %v525_v18  ;;  %vm194_vm4 = vcmp.lt.s32.totalorder %v525_v18, %v531_v20  ;;  %v179_v24 = vadd.s32 32, %v525_v18 }
   0xb   :  { %375 = vmatmul.mubr.msk.bf16.vlgmr.msra.gmra.mxu1 %vm48_vm2, %v33_v16  ;;  %v178_v25 = vadd.s32 24, %v525_v18  ;;  %v181_v32 = vadd.s32 48, %v525_v18  ;;  %v324_v33 = vsel %vm194_vm4, 1.0, %v453_v30  ;;  %v180_v36 = vadd.s32 40, %v525_v18  ;;  %p395_p3 = por %p394_p2, %p393_p1 }
   0xc   :  { %vm196_vm3 = vcmp.lt.s32.totalorder %v177_v19, %v531_v20  ;;  %vm195_vm5 = vcmp.lt.s32.totalorder %v176_v21, %v531_v20  ;;  %vm198_vm6 = vcmp.lt.s32.totalorder %v179_v24, %v531_v20  ;;  %v182_v38 = vadd.s32 56, %v525_v18 }
   0xd   :  { %v326_v31 = vsel %vm196_vm3, 1.0, %v453_v30  ;;  %vm197_vm7 = vcmp.lt.s32.totalorder %v178_v25, %v531_v20  ;;  %v325_v43 = vsel %vm195_vm5, 1.0, %v453_v30  ;;  %vm199_vm8 = vcmp.lt.s32.totalorder %v180_v36, %v531_v20  ;;  %p396_p4 = pnand %p395_p3, %p389_p0 }
   0xe   :  { %v327_v50 = vsel %vm197_vm7, 1.0, %v453_v30  ;;  %vm200_vm9 = vcmp.lt.s32.totalorder %v181_v32, %v531_v20  ;;  %v328_v56 = vsel %vm198_vm6, 1.0, %v453_v30  ;;  %vm201_vm10 = vcmp.lt.s32.totalorder %v182_v38, %v531_v20 }
   0xf   :  { %v329_v61 = vsel %vm199_vm8, 1.0, %v453_v30 }
  0xca   :  { %v372_v22 = vpop.f32.mrf.mxu0 }
  0xcb   :  { %v376_v23 = vpop.f32.mrf.mxu1  ;;  %v111_v37 = vadd.f32 %v372_v22, %v310_v26 }
  0xcc   :  { %v102_v27 = vpop.f32.mrf.mxu0  ;;  %v127_v39 = vadd.f32 %v376_v23, %v310_v26 }
  0xcd   :  { %v118_v28 = vpop.f32.mrf.mxu1  ;;  %v103_v29 = vadd.f32 %v310_v26, %v102_v27  ;;  %v220_v52 = vmul.f32 %v326_v31, %v111_v37 }
  0xce   :  { %v373_v34 = vpop.f32.mrf.mxu0  ;;  %v119_v46 = vadd.f32 %v310_v26, %v118_v28 }
  0xcf   :  { %v377_v35 = vpop.f32.mrf.mxu1  ;;  %v114_v40 = vadd.f32 %v373_v34, %v310_v26  ;;  %v218_v45 = vmul.f32 %v324_v33, %v103_v29 }
  0xd0   :  { %v130_v41 = vadd.f32 %v377_v35, %v310_v26  ;;  %v105_v42 = vpop.f32.mrf.mxu0 }
  0xd1   :  { %v121_v44 = vpop.f32.mrf.mxu1  ;;  %v106_v47 = vadd.f32 %v310_v26, %v105_v42  ;;  %v348_v49 = vpack.c.bf16 %v114_v40, %v111_v37  ;;  %v239_v57 = vmul.f32 %v218_v45, %v103_v29  ;;  %v221_v58 = vmul.f32 %v327_v50, %v114_v40 }
  0xd2   :  { %v122_v48 = vadd.f32 %v310_v26, %v121_v44  ;;  %v358_v51 = vpack.c.bf16 %v130_v41, %v127_v39 }
  0xd3   :  { %v343_v53 = vpack.c.bf16 %v106_v47, %v103_v29  ;;  %v219_v54 = vmul.f32 %v325_v43, %v106_v47  ;;  %360 = vst [vmem:[#allocation4 + $0x8] sm:$0xff] %v348_v49  }
  0xd4   :  { %v353_v55 = vpack.c.bf16 %v122_v48, %v119_v46  ;;  %362 = vst [vmem:[#allocation4 + $0x18] sm:$0xff] %v358_v51  }
  0xd5   :  { %344 = vst [vmem:[#allocation4] sm:$0xff] %v343_v53   ;;  %v226_v59 = vadd.f32 %v219_v54, %v218_v45  ;;  %v240_v60 = vmul.f32 %v219_v54, %v106_v47 }
  0xd6   :  { %361 = vst [vmem:[#allocation4 + $0x10] sm:$0xff] %v353_v55  }
  0xd7   :  { %399 = shalt.err (!%p396_p4)
}
  0xd8   :  { %s455_s18 = smov 64   ;;  %s456_s19 = smov 4   ;;  %v241_v62 = vmul.f32 %v220_v52, %v111_v37  ;;  %v222_v63 = vmul.f32 %v328_v56, %v119_v46  ;;  %v227_v0 = vadd.f32 %v226_v59, %v220_v52  ;;  %v247_v1 = vadd.f32 %v240_v60, %v239_v57 }
  0xd9   :  { %278 = dma.vmem_to_hbm [thread:$0]  %s555_s3, 512, %s594_s4, [#allocation5], %s455_s18, %s455_s18, %s456_s19   ;;  %v330_v2 = vsel %vm200_vm9, 1.0, %v453_v30  ;;  %v242_v3 = vmul.f32 %v221_v58, %v114_v40  ;;  %v223_v5 = vmul.f32 %v329_v61, %v122_v48  ;;  %v331_v7 = vsel %vm201_vm10, 1.0, %v453_v30 }
  0xda   :  { %v248_v4 = vadd.f32 %v247_v1, %v241_v62  ;;  %v228_v6 = vadd.f32 %v227_v0, %v221_v58  ;;  %v224_v8 = vmul.f32 %v330_v2, %v127_v39  ;;  %v243_v9 = vmul.f32 %v222_v63, %v119_v46  ;;  %s457_s4 = smov [#allocation6]   ;;  %s458_s23 = smov [#allocation8]  }
  0xdb   :  { %v225_v12 = vmul.f32 %v331_v7, %v130_v41  ;;  %v244_v14 = vmul.f32 %v223_v5, %v122_v48  ;;  %s285_s22 = sshll.u32 %s457_s4, 4  ;;  %vm260_vm11 = vcmp.eq.s32.totalorder %v525_v18, 0  ;;  %s295_s24 = sshll.u32 %s458_s23, 4  ;;  %s286_s22 = int_to_ptr.vmem [resolvable:$true] %s285_s22  ;;  %s296_s24 = int_to_ptr.vmem [resolvable:$true] %s295_s24 }
  0xdc   :  { %v229_v10 = vadd.f32 %v228_v6, %v222_v63  ;;  %v249_v11 = vadd.f32 %v248_v4, %v242_v3  ;;  %v245_v16 = vmul.f32 %v224_v8, %v127_v39  ;;  %s408_s25 = scalar_lea.vmem %s286_s22, 128  ;;  %p413_p6 = scmp.lt.s32.totalorder %s286_s22, %s286_s22 }
  0xdd   :  { %v246_v21 = vmul.f32 %v225_v12, %v130_v41  ;;  %p409_p5 = scmp.ne.s32.totalorder %s286_s22, %s408_s25  ;;  %p414_p7 = scmp.lt.s32.totalorder %s408_s25, %s408_s25 }
  0xde   :  { %v230_v13 = vadd.f32 %v229_v10, %v223_v5  ;;  %v250_v15 = vadd.f32 %v249_v11, %v243_v9 }
  0xdf   :  { %p415_p8 = por %p414_p7, %p413_p6 }
  0xe0   :  { %v231_v17 = vadd.f32 %v230_v13, %v224_v8  ;;  %v251_v19 = vadd.f32 %v250_v15, %v244_v14 }
  0xe1   :  { %p416_p9 = pnand %p415_p8, %p409_p5 }
  0xe2   :  { %v252_v22 = vadd.f32 %v251_v19, %v245_v16  ;;  %v232_v23 = vadd.f32 %v231_v17, %v225_v12 }
  0xe4   :  { %v233_v24 = vrot.slane %v232_v23, 4  ;;  %v253_v25 = vadd.f32 %v252_v22, %v246_v21 }
  0xe6   :  { %v234_v26 = vadd.f32 %v233_v24, %v232_v23  ;;  %v254_v27 = vrot.slane %v253_v25, 4 }
  0xe8   :  { %v235_v20 = vrot.slane %v234_v26, 2  ;;  %v255_v28 = vadd.f32 %v254_v27, %v253_v25 }
  0xea   :  { %v236_v29 = vadd.f32 %v235_v20, %v234_v26  ;;  %v256_v30 = vrot.slane %v255_v28, 2 }
  0xec   :  { %v237_v31 = vrot.slane %v236_v29, 1  ;;  %v257_v32 = vadd.f32 %v256_v30, %v255_v28 }
  0xee   :  { %v238_v33 = vadd.f32 %v237_v31, %v236_v29  ;;  %v258_v34 = vrot.slane %v257_v32, 1 }
  0xf0   :  { %v263_v35 = vsel %vm260_vm11, %v238_v33, 0.0  ;;  %v259_v36 = vadd.f32 %v258_v34, %v257_v32 }
  0xf1   :  { %264 = vst [vmem:[#allocation6] sm:$0xff] %v263_v35 }
  0xf2   :  { %419 = shalt.err (!%p416_p9)
}
  0xf3   :  { %288 = dma.vmem_to_hbm [thread:$0]  %s286_s22, 128, %s595_s5, [#allocation7]   ;;  %v265_v37 = vsel %vm260_vm11, %v259_v36, 0.0 }
  0xf4   :  { %266 = vst [vmem:[#allocation8] sm:$0xff] %v265_v37  ;;  %s428_s28 = scalar_lea.vmem %s296_s24, 128  ;;  %p433_p11 = scmp.lt.s32.totalorder %s296_s24, %s296_s24 }
  0xf5   :  { %p429_p10 = scmp.ne.s32.totalorder %s296_s24, %s428_s28  ;;  %p434_p12 = scmp.lt.s32.totalorder %s428_s28, %s428_s28 }
  0xf7   :  { %p435_p13 = por %p434_p12, %p433_p11 }
  0xf9   :  { %p436_p0 = pnand %p435_p13, %p429_p10 }
  0xfb   :  { %439 = shalt.err (!%p436_p0)
}
  0xfc   :  { %298 = dma.vmem_to_hbm [thread:$0]  %s296_s24, 128, %s596_s6, [#allocation7]  }
  0xfd   :  { %448 = dma.done.wait [#allocation5], 512  }
  0xfe   :  { %449 = vsyncadd [#allocation5], 4294966784 }
  0xff   :  { %450 = dma.done.wait [#allocation7], 256  }
 0x100   :  { %451 = vsyncadd [#allocation7], 4294967040 }
 0x101   :  { %308 = vsyncpa [#allocation5], 1 }
 0x102   :  { %309 = vsyncpa [#allocation7], 1 }

</bundles_post_ra>
